<compile_context>
chip_gen: v5e
topology: v5e:2x2
jax: 0.10.0
libtpu: 0.0.40
codegen_flags: <defaults>
</compile_context>

<pallas_src>
import math

import jax
import jax.numpy as jnp
from jax.experimental import pallas as pl
from jax.experimental.pallas import tpu as pltpu


def _relu_kernel(x_ref, o_ref):
    # One VPU vmax per vreg; dtypes already match, no cast.
    o_ref[...] = jnp.maximum(x_ref[...], 0)


def _vmem_capacity_bytes():
    try:
        return int(pltpu.get_tpu_info().vmem_capacity_bytes)
    except Exception:
        return 64 << 20  # conservative fallback: v7x per-TensorCore VMEM


def _relu_slab(slab, *, donate=False):
    """Run the ReLU kernel on a lane-dense 2-D slab (rows, width), width % 128 == 0."""
    rows, width = slab.shape
    itemsize = jnp.dtype(slab.dtype).itemsize
    pack = max(8, 32 // itemsize)          # sublane packing: 8 f32 / 16 bf16 / 32 int8
    slab_bytes = rows * width * itemsize

    # Chip-adaptive budget: v7x has 64 MiB VMEM per TC, v5e/v6e have 128 MiB.
    if _vmem_capacity_bytes() >= (100 << 20):
        target_block_bytes, vmem_limit = 8 << 20, 48 << 20   # v5e / v6e
    else:
        target_block_bytes, vmem_limit = 4 << 20, 32 << 20   # v7x (64 MiB VMEM)

    # Grid steps: enough to hit the per-block byte target, but never a single
    # (or odd) step once the slab is big enough to split across v7x's two TCs.
    g = max(1, math.ceil(slab_bytes / target_block_bytes))
    if slab_bytes > (2 << 20):
        g = max(g, 2)
        if g % 2:
            g += 1
    block_rows = math.ceil(rows / g)
    block_rows = math.ceil(block_rows / pack) * pack   # (8,128)-rule / packing aligned
    block_rows = min(block_rows, rows)                 # full extent is always legal
    grid = (pl.cdiv(rows, block_rows),)

    return pl.pallas_call(
        _relu_kernel,
        out_shape=jax.ShapeDtypeStruct((rows, width), slab.dtype),
        grid_spec=pltpu.PrefetchScalarGridSpec(
            num_scalar_prefetch=0,
            grid=grid,
            in_specs=[pl.BlockSpec((block_rows, width), lambda i: (i, 0))],
            out_specs=pl.BlockSpec((block_rows, width), lambda i: (i, 0)),
        ),
        compiler_params=pltpu.CompilerParams(
            # "parallel" lets the runtime shard the 1-D grid across both v7x TCs;
            # if measurement shows the grid is not actually split, switch to
            # pltpu.CORE_PARALLEL or an explicit pl.core_map over a TC mesh.
            dimension_semantics=("parallel",),
            vmem_limit_bytes=vmem_limit,
        ),
        cost_estimate=pl.CostEstimate(
            flops=rows * width,
            transcendentals=0,
            bytes_accessed=2 * slab_bytes,
        ),
        input_output_aliases=({0: 0} if donate else {}),
    )(slab)


def relu_pallas(x, *, donate=False):
    """Elementwise ReLU for an array of arbitrary shape via a Pallas TPU kernel.

    Set donate=True only if the caller no longer needs `x` (output aliases its buffer).
    """
    orig_shape = x.shape
    n = x.size
    if n == 0:
        return x

    flat = x.reshape(-1)

    # 128-aligned prefix goes through the kernel (zero-copy reshape); the rare
    # <128-element ragged tail is computed directly — no pad/slice round trip.
    rem = n % 128
    n_main = n - rem
    if n_main == 0:
        return jnp.maximum(x, 0)   # whole array smaller than one lane row

    head = flat if rem == 0 else flat[:n_main]

    # Widest lane-dense slab width (multiple of 128) dividing the prefix exactly.
    width = 128
    for cand in (4096, 2048, 1024, 512, 384, 256):
        if n_main % cand == 0:
            width = cand
            break
    slab = head.reshape(n_main // width, width)

    out_main = _relu_slab(slab, donate=donate)

    if rem == 0:
        return out_main.reshape(orig_shape)
    tail = jnp.maximum(flat[n_main:], 0)
    return jnp.concatenate([out_main.reshape(-1), tail]).reshape(orig_shape)


if __name__ == "__main__":
    key = jax.random.PRNGKey(0)
    x = jax.random.normal(key, (2, 4, 16, 16), dtype=jnp.float32)  # NCHW

    y = relu_pallas(x)
    jax.block_until_ready(y)

    # Correctness check against plain JAX reference.
    y_ref = jnp.maximum(x, 0)
    assert y.shape == x.shape and y.dtype == x.dtype
    assert jnp.allclose(y, y_ref), "mismatch vs reference ReLU"

    print("KERNEL_OK")
</pallas_src>

<mosaic_0001>
module attributes {stable_mosaic.version = 11 : i64} {
  func.func @_relu_kernel(%arg0: i32, %arg1: memref<1x2048xf32, #tpu.memory_space<vmem>>, %arg2: memref<1x2048xf32, #tpu.memory_space<vmem>>) attributes {dimension_semantics = [#tpu.dimension_semantics<parallel>], iteration_bounds = array<i64: 1>, scalar_prefetch = 0 : i64, scratch_operands = 0 : i64, tpu.core_type = #tpu.core_type<tc>, window_params = [{transform_indices = @transform_0, window_bounds = array<i64: 1, 2048>}, {transform_indices = @transform_1, window_bounds = array<i64: 1, 2048>}]} {
    %c0 = arith.constant 0 : index
    %c0_0 = arith.constant 0 : index
    %0 = vector.load %arg1[%c0, %c0_0] : memref<1x2048xf32, #tpu.memory_space<vmem>>, vector<1x2048xf32>
    %cst = arith.constant 0.000000e+00 : f32
    %1 = vector.broadcast %cst : f32 to vector<1x2048xf32>
    %2 = arith.maximumf %0, %1 : vector<1x2048xf32>
    %c0_1 = arith.constant 0 : index
    %c0_2 = arith.constant 0 : index
    %3 = vector.load %arg2[%c0_1, %c0_2] : memref<1x2048xf32, #tpu.memory_space<vmem>>, vector<1x2048xf32>
    tpu.vector_store %arg2[%c0_1, %c0_2], %2 {strides = array<i32>} : memref<1x2048xf32, #tpu.memory_space<vmem>>, vector<1x2048xf32>,
    return
  }
  func.func @transform_0(%arg0: i32) -> (i32, i32) {
    %c0_i32 = arith.constant 0 : i32
    %c0_i32_0 = arith.constant 0 : i32
    return %arg0, %c0_i32 : i32, i32
  }
  func.func @transform_1(%arg0: i32) -> (i32, i32) {
    %c0_i32 = arith.constant 0 : i32
    %c0_i32_0 = arith.constant 0 : i32
    return %arg0, %c0_i32 : i32, i32
  }
}

</mosaic_0001>

<bundles_post_ra>
// kernel: tpu_custom_call.1
= control target key start
LH: loop header
LB: loop body
LE: loop exit
PB: predicated region body
PF: predicated region fallthrough
CT: control target
= control target key end

     0   :  { %6 = vsyncpa [#allocation3], 0  ;;  %s118_s0 = inlined_call_operand.hbm [shape: f32[1,2048], index: 0, kind: input, shape index: {}]   ;;  %s119_s1 = inlined_call_operand.hbm [shape: f32[1,2048], index: 1, kind: output, shape index: {}]  }
   0x1   :  { %7 = vsyncpa [#allocation4], 0  ;;  %s13_s8 = sshll.u32 %s118_s0, 4  ;;  %s100_s9 = smov [#allocation2]   ;;  %s14_s8 = int_to_ptr.hbm [resolvable:$true] %s13_s8 }
   0x2   :  { %s15_s10 = sshll.u32 %s100_s9, 4  ;;  %s16_s10 = int_to_ptr.vmem [resolvable:$true] %s15_s10 }
   0x3   :  { %18 = dma.hbm_to_vmem [thread:$0]  %s14_s8, 256, %s16_s10, [#allocation3]  }
   0x4   :  { %96 = dma.done.wait [#allocation3], 256  }
   0x5   :  { %97 = vsyncadd [#allocation3], 4294967040  ;;  %s101_s11 = smov [#allocation5]   ;;  %s36_s15 = sshll.u32 %s119_s1, 4  ;;  %v23_v0 = vld [vmem:[#allocation2] sm:$0xff]  ;;  %v24_v1 = vld [vmem:[#allocation2 + $0x8] sm:$0xff]  ;;  %s37_s15 = int_to_ptr.hbm [resolvable:$true] %s36_s15 }
   0x6   :  { %s34_s12 = sshll.u32 %s101_s11, 4  ;;  %v25_v2 = vmax.f32 %v23_v0, 0.0  ;;  %v26_v3 = vmax.f32 %v24_v1, 0.0  ;;  %s35_s12 = int_to_ptr.vmem [resolvable:$true] %s34_s12 }
   0x8   :  { %27 = vst [vmem:[#allocation5] sm:$0xff] %v25_v2 }
   0x9   :  { %28 = vst [vmem:[#allocation5 + $0x8] sm:$0xff] %v26_v3 }
   0xa   :  { %39 = dma.vmem_to_hbm [thread:$0]  %s35_s12, 256, %s37_s15, [#allocation4]  }
   0xb   :  { %98 = dma.done.wait [#allocation4], 256  }
   0xc   :  { %99 = vsyncadd [#allocation4], 4294967040 }
   0xd   :  { %44 = vsyncpa [#allocation3], 1 }
   0xe   :  { %45 = vsyncpa [#allocation4], 1 }

</bundles_post_ra>
